<compile_context>
chip_gen: v6e
topology: v6e:2x2x1
jax: 0.10.0
libtpu: 0.0.40
codegen_flags: <defaults>
</compile_context>

<pallas_src>
import math

import jax
import jax.numpy as jnp
from jax.experimental import pallas as pl
from jax.experimental.pallas import tpu as pltpu

_MIB = 1024 * 1024


def _layer_scale_kernel(x_ref, gamma_ref, o_ref):
    # x_ref: (TM, Dk) row tile; gamma_ref: (1, Dk) broadcast row.
    o_ref[...] = x_ref[...] * gamma_ref[...]


def _vmem_budgets() -> tuple[int, int]:
    """Returns (buffer_budget_bytes, vmem_limit_bytes), chip-aware with a safe fallback."""
    try:
        vmem_cap = int(getattr(pltpu.get_tpu_info(), "vmem_capacity_bytes"))
    except Exception:
        vmem_cap = 64 * _MIB  # conservative (v7x per-TC size)
    if vmem_cap <= 64 * _MIB:
        # v7x-class: keep live double-buffered tiles small, leave headroom.
        buf_budget = 20 * _MIB
    else:
        # v5e / v6e: 128 MiB physical; raise well past the 16/32 MiB scoped default.
        buf_budget = 48 * _MIB
    vmem_limit = min(vmem_cap - 8 * _MIB, buf_budget + 8 * _MIB)
    return buf_budget, vmem_limit


def layer_scale(x: jax.Array, gamma: jax.Array) -> jax.Array:
    """x: (..., D), gamma: (D,). Returns x * gamma (broadcast over all leading dims)."""
    orig_shape = x.shape
    D = orig_shape[-1]
    assert gamma.shape == (D,), f"gamma must be ({D},), got {gamma.shape}"

    # ---- flatten leading dims -------------------------------------------------
    N = 1
    for s in orig_shape[:-1]:
        N *= s
    x2 = x.reshape(N, D)
    gamma = gamma.astype(x.dtype)

    # ---- fold rows so the last dim is lane-dense (multiple of 128) ------------
    k = 128 // math.gcd(D, 128)
    if k > 1 and N % k == 0:
        x2 = x2.reshape(N // k, k * D)        # row-major: k consecutive rows per folded row
        gamma_row = jnp.tile(gamma, k).reshape(1, k * D)
    else:
        gamma_row = gamma.reshape(1, D)
    rows, Dk = x2.shape

    # ---- auto-size the row tile from the VMEM budget ---------------------------
    buf_budget, vmem_limit = _vmem_budgets()
    itemsize = jnp.dtype(x2.dtype).itemsize
    sublane = {4: 8, 2: 16, 1: 32}.get(itemsize, 8)
    # Live VMEM ~= 2x(in tile) + 2x(out tile) when double-buffered.
    max_tm = max(sublane, buf_budget // (4 * Dk * itemsize))
    max_tm = (max_tm // sublane) * sublane

    if rows <= max_tm:
        tm = rows                      # single tile; block == full array dims (always legal)
        rows_p = rows
    else:
        tm = max_tm                    # multiple of the sublane count
        rows_p = pl.cdiv(rows, tm) * tm
        if rows_p != rows:
            x2 = jnp.pad(x2, ((0, rows_p - rows), (0, 0)))
    n_tiles = rows_p // tm

    out2 = pl.pallas_call(
        _layer_scale_kernel,
        out_shape=jax.ShapeDtypeStruct((rows_p, Dk), x2.dtype),
        grid_spec=pltpu.PrefetchScalarGridSpec(
            num_scalar_prefetch=0,
            grid=(n_tiles,),
            in_specs=[
                pl.BlockSpec((tm, Dk), lambda i: (i, 0)),
                pl.BlockSpec((1, Dk), lambda i: (0, 0)),
            ],
            out_specs=pl.BlockSpec((tm, Dk), lambda i: (i, 0)),
        ),
        compiler_params=pltpu.CompilerParams(
            dimension_semantics=("parallel",),
            vmem_limit_bytes=int(vmem_limit),
        ),
    )(x2, gamma_row)

    if rows_p != rows:
        out2 = out2[:rows]
    return out2.reshape(orig_shape)


if __name__ == "__main__":
    key = jax.random.PRNGKey(0)

    # Shapes consistent with the module's forward: (batch, seq, hidden) with gamma over hidden.
    B, S, D = 2, 8, 32
    init_values = 1e-5

    x = jax.random.normal(key, (B, S, D), dtype=jnp.float32)
    gamma = init_values * jnp.ones((D,), dtype=jnp.float32)   # exactly the module's init

    out = layer_scale(x, gamma)
    out = jax.block_until_ready(out)

    ref = x * gamma
    assert out.shape == x.shape and out.dtype == x.dtype
    assert jnp.allclose(out, ref, rtol=1e-6, atol=1e-6)

    # Second small check exercising the row-fold (D=48 -> folded lane width 384).
    k2 = jax.random.PRNGKey(1)
    x2 = jax.random.normal(k2, (3, 8, 48), dtype=jnp.float32)
    g2 = init_values * jnp.ones((48,), dtype=jnp.float32)
    out2 = jax.block_until_ready(layer_scale(x2, g2))
    assert jnp.allclose(out2, x2 * g2, rtol=1e-6, atol=1e-6)

    print("KERNEL_OK")
</pallas_src>

<mosaic_0001>
module attributes {stable_mosaic.version = 11 : i64} {
  func.func @_layer_scale_kernel(%arg0: i32, %arg1: memref<4x128xf32, #tpu.memory_space<vmem>>, %arg2: memref<1x128xf32, #tpu.memory_space<vmem>>, %arg3: memref<4x128xf32, #tpu.memory_space<vmem>>) attributes {dimension_semantics = [#tpu.dimension_semantics<parallel>], iteration_bounds = array<i64: 1>, scalar_prefetch = 0 : i64, scratch_operands = 0 : i64, tpu.core_type = #tpu.core_type<tc>, window_params = [{transform_indices = @transform_0, window_bounds = array<i64: 4, 128>}, {pipeline_mode = #tpu.pipeline_mode<synchronous>, transform_indices = @transform_1, window_bounds = array<i64: 1, 128>}, {transform_indices = @transform_2, window_bounds = array<i64: 4, 128>}]} {
    %c0 = arith.constant 0 : index
    %c0_0 = arith.constant 0 : index
    %0 = vector.load %arg1[%c0, %c0_0] : memref<4x128xf32, #tpu.memory_space<vmem>>, vector<4x128xf32>
    %c0_1 = arith.constant 0 : index
    %c0_2 = arith.constant 0 : index
    %1 = vector.load %arg2[%c0_1, %c0_2] : memref<1x128xf32, #tpu.memory_space<vmem>>, vector<1x128xf32>
    %2 = vector.broadcast %1 : vector<1x128xf32> to vector<4x128xf32>
    %3 = arith.mulf %0, %2 : vector<4x128xf32>
    %c0_3 = arith.constant 0 : index
    %c0_4 = arith.constant 0 : index
    %4 = vector.load %arg3[%c0_3, %c0_4] : memref<4x128xf32, #tpu.memory_space<vmem>>, vector<4x128xf32>
    tpu.vector_store %arg3[%c0_3, %c0_4], %3 {strides = array<i32>} : memref<4x128xf32, #tpu.memory_space<vmem>>, vector<4x128xf32>,
    return
  }
  func.func @transform_0(%arg0: i32) -> (i32, i32) {
    %c0_i32 = arith.constant 0 : i32
    %c0_i32_0 = arith.constant 0 : i32
    return %arg0, %c0_i32 : i32, i32
  }
  func.func @transform_1(%arg0: i32) -> (i32, i32) {
    %c0_i32 = arith.constant 0 : i32
    %c0_i32_0 = arith.constant 0 : i32
    %c0_i32_1 = arith.constant 0 : i32
    return %c0_i32, %c0_i32_0 : i32, i32
  }
  func.func @transform_2(%arg0: i32) -> (i32, i32) {
    %c0_i32 = arith.constant 0 : i32
    %c0_i32_0 = arith.constant 0 : i32
    return %arg0, %c0_i32 : i32, i32
  }
}

</mosaic_0001>

<bundles_post_ra>
// kernel: tpu_custom_call.1
= control target key start
LH: loop header
LB: loop body
LE: loop exit
PB: predicated region body
PF: predicated region fallthrough
CT: control target
= control target key end

     0   :  { %7 = vsyncpa [#allocation3], 0  ;;  %s122_s0 = inlined_call_operand.hbm [shape: f32[4,128], index: 0, kind: input, shape index: {}]   ;;  %s123_s1 = inlined_call_operand.vmem [shape: f32[1,128], index: 1, kind: input, shape index: {}]   ;;  %s124_s2 = inlined_call_operand.hbm [shape: f32[4,128], index: 2, kind: output, shape index: {}]  }
   0x1   :  { %8 = vsyncpa [#allocation4], 0  ;;  %s96_s9 = smov [#allocation2]  }
   0x2   :  { %s15_s10 = sshll.u32 %s96_s9, 4  ;;  %s16_s10 = int_to_ptr.vmem [resolvable:$true] %s15_s10 }
   0x3   :  { %s60_s11 = scalar_lea.vmem %s16_s10, 64  ;;  %p65_p1 = scmp.lt.s32.totalorder %s16_s10, %s16_s10 }
   0x4   :  { %p61_p0 = scmp.ne.s32.totalorder %s16_s10, %s60_s11  ;;  %p66_p2 = scmp.lt.s32.totalorder %s60_s11, %s60_s11 }
   0x6   :  { %p67_p3 = por %p66_p2, %p65_p1 }
   0x8   :  { %p68_p4 = pnand %p67_p3, %p61_p0 }
   0xa   :  { %71 = shalt.err (!%p68_p4)
}
   0xb   :  { %18 = dma.hbm_to_vmem [thread:$0]  %s122_s0, 64, %s16_s10, [#allocation3]  }
   0xc   :  { %92 = dma.done.wait [#allocation3], 64  }
   0xd   :  { %93 = vsyncadd [#allocation3], 4294967232  ;;  %s97_s14 = smov [#allocation5]   ;;  %v24_v0 = vld [vmem:[#allocation2] sm:$0xf] }
   0xe   :  { %s40_s15 = sshll.u32 %s97_s14, 4  ;;  %v49_v1 = vld [vmem:[%s123_s1] ss:$0 sm:$0xff]  ;;  %s41_s15 = int_to_ptr.vmem [resolvable:$true] %s40_s15 }
   0xf   :  { %v32_v2 = vmul.f32 %v49_v1, %v24_v0  ;;  %s72_s18 = scalar_lea.vmem %s41_s15, 64  ;;  %p77_p6 = scmp.lt.s32.totalorder %s41_s15, %s41_s15 }
  0x10   :  { %p73_p5 = scmp.ne.s32.totalorder %s41_s15, %s72_s18  ;;  %p78_p7 = scmp.lt.s32.totalorder %s72_s18, %s72_s18 }
  0x11   :  { %33 = vst [vmem:[#allocation5] sm:$0xf] %v32_v2 }
  0x12   :  { %p79_p8 = por %p78_p7, %p77_p6 }
  0x14   :  { %p80_p9 = pnand %p79_p8, %p73_p5 }
  0x16   :  { %83 = shalt.err (!%p80_p9)
}
  0x17   :  { %43 = dma.vmem_to_hbm [thread:$0]  %s41_s15, 64, %s124_s2, [#allocation4]  }
  0x18   :  { %94 = dma.done.wait [#allocation4], 64  }
  0x19   :  { %95 = vsyncadd [#allocation4], 4294967232 }
  0x1a   :  { %47 = vsyncpa [#allocation3], 1 }
  0x1b   :  { %48 = vsyncpa [#allocation4], 1 }

</bundles_post_ra>
